<compile_context>
chip_gen: v5e
topology: v5e:2x2
jax: 0.10.0
libtpu: 0.0.40
codegen_flags: <defaults>
</compile_context>

<pallas_src>
import jax
import jax.numpy as jnp
from jax.experimental import pallas as pl
from jax.experimental.pallas import tpu as pltpu

_LANES = 128
_SUBLANES = 8
_ROW_QUANTUM = _LANES * _SUBLANES  # 1024: batch padding / tile-size quantum


def _two_layer_kernel(x_ref, p_ref, o_ref):
    """x_ref: (2, R, 128) VMEM, p_ref: (9,) SMEM, o_ref: (R, 128) VMEM.

    Parameter packing (row-major PyTorch layout):
      p[0..3] = w1.flatten()   (w1 is (out=2, in=2))
      p[4..5] = b1
      p[6..7] = w2.flatten()   (w2 is (out=1, in=2))
      p[8]    = b2
    """
    x0 = x_ref[0]  # (R, 128) dense slab: feature 0, batch over sublanes+lanes
    x1 = x_ref[1]  # (R, 128) dense slab: feature 1

    w1_00 = p_ref[0]
    w1_01 = p_ref[1]
    w1_10 = p_ref[2]
    w1_11 = p_ref[3]
    b1_0 = p_ref[4]
    b1_1 = p_ref[5]
    w2_00 = p_ref[6]
    w2_01 = p_ref[7]
    b2_0 = p_ref[8]

    # Layer 1 (PyTorch Linear: h_j = sum_i x_i * W[j, i] + b[j]) + ReLU — VPU.
    h0 = jnp.maximum(x0 * w1_00 + x1 * w1_01 + b1_0, 0.0)
    h1 = jnp.maximum(x0 * w1_10 + x1 * w1_11 + b1_1, 0.0)

    # Layer 2 — VPU, full-width unmasked store.
    o_ref[...] = h0 * w2_00 + h1 * w2_01 + b2_0


def two_layer_net_planar(x_planar, params, *, tb=256 * 1024):
    """Forward pass on pre-layouted input.

    Args:
      x_planar: (2, R, 128) float32, R a multiple of 8.  Element (f, r, l) is
        feature f of flat batch index r*128 + l.
      params:   (9,) float32 packed parameters (see _two_layer_kernel).
      tb:       batch elements per grid step; multiple of 1024.
    Returns:
      (R, 128) float32 outputs in the same flat-batch order.
    """
    _, r_total, lanes = x_planar.shape
    assert lanes == _LANES and r_total % _SUBLANES == 0
    b_pad = r_total * _LANES

    tb = min(tb, b_pad)
    tb = max(tb, _ROW_QUANTUM)
    assert tb % _ROW_QUANTUM == 0 and b_pad % tb == 0
    rows_per_block = tb // _LANES
    grid = (b_pad // tb,)

    return pl.pallas_call(
        _two_layer_kernel,
        out_shape=jax.ShapeDtypeStruct((r_total, _LANES), jnp.float32),
        grid=grid,
        in_specs=[
            # Dense sublane-packed input tile: (2, rows_per_block, 128).
            pl.BlockSpec((2, rows_per_block, _LANES), lambda i: (0, i, 0)),
            # 9 scalars, whole array resident in SMEM across all grid steps.
            pl.BlockSpec(memory_space=pltpu.MemorySpace.SMEM),
        ],
        out_specs=pl.BlockSpec((rows_per_block, _LANES), lambda i: (i, 0)),
        compiler_params=pltpu.CompilerParams(
            # Batch axis is embarrassingly parallel -> shards across the two
            # TensorCores on v7x.  ~24 B * tb double-buffered (6 MiB at the
            # default tb) fits every generation's default scoped VMEM; add
            # vmem_limit_bytes here if you raise tb past ~1M on v6e.
            dimension_semantics=("parallel",)),
    )(x_planar, params)


def two_layer_net(x, w1, b1, w2, b2, *, tb=256 * 1024):
    """Forward pass with PyTorch conventions.

    Args:
      x:  (B, 2)  float32  -- (batch, in_features)
      w1: (2, 2)  float32  -- PyTorch layout (out_features, in_features)
      b1: (2,)    float32
      w2: (1, 2)  float32
      b2: (1,)    float32
    Returns:
      (B, 1) float32
    """
    B = x.shape[0]

    # Pick tile: multiple of 1024, clamped to the padded batch; the padded
    # batch is then a multiple of the tile so every block is fully dense.
    b_min = ((B + _ROW_QUANTUM - 1) // _ROW_QUANTUM) * _ROW_QUANTUM
    tb = max(min(tb, b_min), _ROW_QUANTUM)
    tb = (tb // _ROW_QUANTUM) * _ROW_QUANTUM
    b_pad = ((B + tb - 1) // tb) * tb

    # Layout glue required by the (B, 2) convention.
    # TODO(synk): if the producer can emit x feature-major (2, B) already,
    # call two_layer_net_planar directly and skip this extra HBM round-trip.
    xt = jnp.transpose(x)                                   # (2, B)
    if b_pad != B:
        xt = jnp.pad(xt, ((0, 0), (0, b_pad - B)))          # (2, B_pad)
    x_planar = xt.reshape(2, b_pad // _LANES, _LANES)       # (2, R, 128)

    # Pack all 9 parameters into one SMEM-resident array.
    params = jnp.concatenate(
        [w1.reshape(-1), b1.reshape(-1), w2.reshape(-1), b2.reshape(-1)]
    ).astype(jnp.float32)                                   # (9,)

    out_planar = two_layer_net_planar(x_planar, params, tb=tb)  # (R, 128)

    # Row-major flatten restores the original batch order; drop the padding.
    return out_planar.reshape(b_pad)[:B].reshape(B, 1)


def _reference(x, w1, b1, w2, b2):
    h = jnp.maximum(x @ w1.T + b1, 0.0)
    return h @ w2.T + b2


if __name__ == "__main__":
    key = jax.random.PRNGKey(0)
    kx, k1, k2, k3, k4 = jax.random.split(key, 5)

    B = 256  # small demo batch; kernel pads to the 1024-element tile quantum
    x = jax.random.normal(kx, (B, 2), dtype=jnp.float32)

    # Deterministic init mimicking PyTorch Linear's U(-1/sqrt(in), 1/sqrt(in)).
    bound1 = 1.0 / jnp.sqrt(2.0)
    w1 = jax.random.uniform(k1, (2, 2), jnp.float32, -bound1, bound1)
    b1 = jax.random.uniform(k2, (2,), jnp.float32, -bound1, bound1)
    bound2 = 1.0 / jnp.sqrt(2.0)
    w2 = jax.random.uniform(k3, (1, 2), jnp.float32, -bound2, bound2)
    b2 = jax.random.uniform(k4, (1,), jnp.float32, -bound2, bound2)

    out = two_layer_net(x, w1, b1, w2, b2)
    out = jax.block_until_ready(out)

    ref = _reference(x, w1, b1, w2, b2)
    assert out.shape == (B, 1), out.shape
    assert jnp.allclose(out, ref, atol=1e-5, rtol=1e-5), (out, ref)

    print("KERNEL_OK")
</pallas_src>

<mosaic_0001>
module attributes {stable_mosaic.version = 11 : i64} {
  func.func @_two_layer_kernel(%arg0: i32, %arg1: memref<2x8x128xf32, #tpu.memory_space<vmem>>, %arg2: memref<9xf32, #tpu.memory_space<smem>>, %arg3: memref<8x128xf32, #tpu.memory_space<vmem>>) attributes {dimension_semantics = [#tpu.dimension_semantics<parallel>], iteration_bounds = array<i64: 1>, scalar_prefetch = 0 : i64, scratch_operands = 0 : i64, tpu.core_type = #tpu.core_type<tc>, window_params = [{transform_indices = @transform_0, window_bounds = array<i64: 2, 8, 128>}, {transform_indices = @transform_1, window_bounds = array<i64: 9>}, {transform_indices = @transform_2, window_bounds = array<i64: 8, 128>}]} {
    %c0 = arith.constant 0 : index
    %c0_0 = arith.constant 0 : index
    %c0_1 = arith.constant 0 : index
    %0 = vector.load %arg1[%c0, %c0_0, %c0_1] : memref<2x8x128xf32, #tpu.memory_space<vmem>>, vector<1x8x128xf32>
    %1 = vector.shape_cast %0 : vector<1x8x128xf32> to vector<8x128xf32>
    %c1 = arith.constant 1 : index
    %c0_2 = arith.constant 0 : index
    %c0_3 = arith.constant 0 : index
    %2 = vector.load %arg1[%c1, %c0_2, %c0_3] : memref<2x8x128xf32, #tpu.memory_space<vmem>>, vector<1x8x128xf32>
    %3 = vector.shape_cast %2 : vector<1x8x128xf32> to vector<8x128xf32>
    %c0_4 = arith.constant 0 : index
    %4 = memref.load %arg2[%c0_4] : memref<9xf32, #tpu.memory_space<smem>>
    %c1_5 = arith.constant 1 : index
    %5 = memref.load %arg2[%c1_5] : memref<9xf32, #tpu.memory_space<smem>>
    %c2 = arith.constant 2 : index
    %6 = memref.load %arg2[%c2] : memref<9xf32, #tpu.memory_space<smem>>
    %c3 = arith.constant 3 : index
    %7 = memref.load %arg2[%c3] : memref<9xf32, #tpu.memory_space<smem>>
    %c4 = arith.constant 4 : index
    %8 = memref.load %arg2[%c4] : memref<9xf32, #tpu.memory_space<smem>>
    %c5 = arith.constant 5 : index
    %9 = memref.load %arg2[%c5] : memref<9xf32, #tpu.memory_space<smem>>
    %c6 = arith.constant 6 : index
    %10 = memref.load %arg2[%c6] : memref<9xf32, #tpu.memory_space<smem>>
    %c7 = arith.constant 7 : index
    %11 = memref.load %arg2[%c7] : memref<9xf32, #tpu.memory_space<smem>>
    %c8 = arith.constant 8 : index
    %12 = memref.load %arg2[%c8] : memref<9xf32, #tpu.memory_space<smem>>
    %13 = vector.broadcast %4 : f32 to vector<8x128xf32>
    %14 = arith.mulf %1, %13 : vector<8x128xf32>
    %15 = vector.broadcast %5 : f32 to vector<8x128xf32>
    %16 = arith.mulf %3, %15 : vector<8x128xf32>
    %17 = arith.addf %14, %16 : vector<8x128xf32>
    %18 = vector.broadcast %8 : f32 to vector<8x128xf32>
    %19 = arith.addf %17, %18 : vector<8x128xf32>
    %cst = arith.constant 0.000000e+00 : f32
    %20 = vector.broadcast %cst : f32 to vector<8x128xf32>
    %21 = arith.maximumf %19, %20 : vector<8x128xf32>
    %22 = vector.broadcast %6 : f32 to vector<8x128xf32>
    %23 = arith.mulf %1, %22 : vector<8x128xf32>
    %24 = vector.broadcast %7 : f32 to vector<8x128xf32>
    %25 = arith.mulf %3, %24 : vector<8x128xf32>
    %26 = arith.addf %23, %25 : vector<8x128xf32>
    %27 = vector.broadcast %9 : f32 to vector<8x128xf32>
    %28 = arith.addf %26, %27 : vector<8x128xf32>
    %cst_6 = arith.constant 0.000000e+00 : f32
    %29 = vector.broadcast %cst_6 : f32 to vector<8x128xf32>
    %30 = arith.maximumf %28, %29 : vector<8x128xf32>
    %31 = vector.broadcast %10 : f32 to vector<8x128xf32>
    %32 = arith.mulf %21, %31 : vector<8x128xf32>
    %33 = vector.broadcast %11 : f32 to vector<8x128xf32>
    %34 = arith.mulf %30, %33 : vector<8x128xf32>
    %35 = arith.addf %32, %34 : vector<8x128xf32>
    %36 = vector.broadcast %12 : f32 to vector<8x128xf32>
    %37 = arith.addf %35, %36 : vector<8x128xf32>
    %c0_7 = arith.constant 0 : index
    %c0_8 = arith.constant 0 : index
    %38 = vector.load %arg3[%c0_7, %c0_8] : memref<8x128xf32, #tpu.memory_space<vmem>>, vector<8x128xf32>
    tpu.vector_store %arg3[%c0_7, %c0_8], %37 {strides = array<i32>} : memref<8x128xf32, #tpu.memory_space<vmem>>, vector<8x128xf32>,
    return
  }
  func.func @transform_0(%arg0: i32) -> (i32, i32, i32) {
    %c0_i32 = arith.constant 0 : i32
    %c0_i32_0 = arith.constant 0 : i32
    %c0_i32_1 = arith.constant 0 : i32
    return %c0_i32, %arg0, %c0_i32_0 : i32, i32, i32
  }
  func.func @transform_1(%arg0: i32) -> i32 {
    %c0_i32 = arith.constant 0 : i32
    %c0_i32_0 = arith.constant 0 : i32
    return %c0_i32 : i32
  }
  func.func @transform_2(%arg0: i32) -> (i32, i32) {
    %c0_i32 = arith.constant 0 : i32
    %c0_i32_0 = arith.constant 0 : i32
    return %arg0, %c0_i32 : i32, i32
  }
}

</mosaic_0001>

<bundles_post_ra>
// kernel: tpu_custom_call.1
= control target key start
LH: loop header
LB: loop body
LE: loop exit
PB: predicated region body
PF: predicated region fallthrough
CT: control target
= control target key end

     0   :  { %7 = vsyncpa [#allocation3], 0  ;;  %s203_s0 = inlined_call_operand.hbm [shape: f32[2,8,128], index: 0, kind: input, shape index: {}]   ;;  %s204_s1 = inlined_call_operand.hbm [shape: f32[9], index: 1, kind: input, shape index: {}]   ;;  %s205_s2 = inlined_call_operand.hbm [shape: f32[8,128], index: 2, kind: output, shape index: {}]  }
   0x1   :  { %8 = vsyncpa [#allocation5], 0 }
   0x2   :  { %9 = vsyncpa [#allocation4], 0  ;;  %s14_s11 = sshll.u32 %s203_s0, 4  ;;  %s174_s12 = smov [#allocation2]   ;;  %s15_s11 = int_to_ptr.hbm [resolvable:$true] %s14_s11 }
   0x3   :  { %s16_s13 = sshll.u32 %s174_s12, 4  ;;  %s28_s16 = sshll.u32 %s204_s1, 4  ;;  %s17_s13 = int_to_ptr.vmem [resolvable:$true] %s16_s13  ;;  %s29_s16 = int_to_ptr.hbm [resolvable:$true] %s28_s16 }
   0x4   :  { %s175_s17 = smov 128   ;;  %s176_s18 = smov 8  }
   0x5   :  { %22 = dma.hbm_to_vmem [thread:$0]  %s15_s11, 256, %s17_s13, [#allocation3], %s175_s17, %s175_s17, %s176_s18  }
   0x6   :  { %s177_s19 = smov [#allocation6]  }
   0x7   :  { %31 = dma.hbm_to_smem %s29_s16, 16, %s177_s19, [#allocation5]  }
   0x8   :  { %168 = dma.done.wait [#allocation3], 256  }
   0x9   :  { %169 = vsyncadd [#allocation3], 4294967040 }
   0xa   :  { %170 = dma.done.wait [#allocation5], 16  }
   0xb   :  { %171 = vsyncadd [#allocation5], 4294967280 }
   0xc   :  { %40 = sfence }
   0xd   :  { %s44_s0 = sld [smem:[#allocation6]]  ;;  %v41_v0 = vld [vmem:[#allocation2] sm:$0xff]  ;;  %v43_v1 = vld [vmem:[#allocation2 + $0x8] sm:$0xff]  ;;  %s178_s27 = smov [#allocation7]  }
   0xe   :  { %s95_s20 = sld [smem:[#allocation6 + $0x1]]  ;;  %s82_s28 = sshll.u32 %s178_s27, 4  ;;  %s83_s28 = int_to_ptr.vmem [resolvable:$true] %s82_s28 }
   0xf   :  { %s96_s21 = sld [smem:[#allocation6 + $0x2]]  ;;  %s84_s3 = sshll.u32 %s205_s2, 4  ;;  %s85_s3 = int_to_ptr.hbm [resolvable:$true] %s84_s3 }
  0x10   :  { %s97_s22 = sld [smem:[#allocation6 + $0x3]] }
  0x11   :  { %s98_s23 = sld [smem:[#allocation6 + $0x4]] }
  0x12   :  { %s99_s24 = sld [smem:[#allocation6 + $0x5]] }
  0x13   :  { %s100_s1 = sld [smem:[#allocation6 + $0x6]]  ;;  %v53_v2 = vstv %s44_s0 }
  0x14   :  { %s101_s25 = sld [smem:[#allocation6 + $0x7]]  ;;  %v54_v3 = vmul.f32 %v53_v2, %v41_v0  ;;  %v55_v4 = vstv %s95_s20 }
  0x15   :  { %v56_v5 = vmul.f32 %v55_v4, %v43_v1  ;;  %v61_v6 = vstv %s96_s21  ;;  %s102_s26 = sld [smem:[#allocation6 + $0x8]] }
  0x16   :  { %v62_v7 = vmul.f32 %v61_v6, %v41_v0  ;;  %v63_v8 = vstv %s97_s22 }
  0x17   :  { %v57_v9 = vadd.f32 %v56_v5, %v54_v3  ;;  %v58_v10 = vstv %s98_s23  ;;  %v64_v11 = vmul.f32 %v63_v8, %v43_v1 }
  0x18   :  { %v66_v12 = vstv %s99_s24 }
  0x19   :  { %v59_v13 = vadd.f32 %v58_v10, %v57_v9  ;;  %v65_v14 = vadd.f32 %v64_v11, %v62_v7  ;;  %v69_v15 = vstv %s100_s1 }
  0x1a   :  { %v71_v18 = vstv %s101_s25 }
  0x1b   :  { %v60_v16 = vmax.f32 %v59_v13, 0.0  ;;  %v67_v17 = vadd.f32 %v66_v12, %v65_v14  ;;  %v74_v22 = vstv %s102_s26 }
  0x1d   :  { %v68_v19 = vmax.f32 %v67_v17, 0.0  ;;  %v70_v20 = vmul.f32 %v69_v15, %v60_v16 }
  0x1f   :  { %v72_v21 = vmul.f32 %v71_v18, %v68_v19 }
  0x21   :  { %v73_v23 = vadd.f32 %v72_v21, %v70_v20 }
  0x23   :  { %v75_v24 = vadd.f32 %v74_v22, %v73_v23 }
  0x25   :  { %76 = vst [vmem:[#allocation7] sm:$0xff] %v75_v24 }
  0x26   :  { %87 = dma.vmem_to_hbm [thread:$0]  %s83_s28, 128, %s85_s3, [#allocation4]  }
  0x27   :  { %172 = dma.done.wait [#allocation4], 128  }
  0x28   :  { %173 = vsyncadd [#allocation4], 4294967168 }
  0x29   :  { %92 = vsyncpa [#allocation3], 1 }
  0x2a   :  { %93 = vsyncpa [#allocation4], 1 }
  0x2b   :  { %94 = vsyncpa [#allocation5], 1 }

</bundles_post_ra>
